<compile_context>
chip_gen: v6e
topology: v6e:2x2x1
jax: 0.10.0
libtpu: 0.0.40
codegen_flags: <defaults>
</compile_context>

<pallas_src>
import functools

import jax
import jax.numpy as jnp
from jax.experimental import pallas as pl
from jax.experimental.pallas import tpu as pltpu

SEG_DIM = 2     # binary segmentation (background / foreground), as in LINEMOD training
VER_DIM = 18    # 9 keypoints * 2 vertex-field channels
HEAD_DIM = SEG_DIM + VER_DIM

# rows of the per-tile stats block (lane-folded partial sums, 128 lanes wide)
_ROW_CE, _ROW_VLOSS, _ROW_WSUM, _ROW_TP, _ROW_FP, _ROW_FN = range(6)
_STATS_ROWS = 8  # padded to a full sublane tile


def _fold_lanes_to_128(row):
    """Sum a (r, TILE) array down to (r, 128) with 128-aligned (free) vreg selects."""
    width = row.shape[-1]
    acc = row[:, 0:128]
    for k in range(1, width // 128):
        acc = acc + row[:, k * 128:(k + 1) * 128]
    return acc


def netwrapper_kernel(x_ref, w_ref, b_ref, mask_ref, vert_ref, vw_ref,
                      seg_ref, ver_ref, stats_ref, *, hw_true, needs_valid_mask):
    t = pl.program_id(1)
    tile = x_ref.shape[-1]

    x = x_ref[0]                                         # (Cin, TILE) f32

    # ---- "net": fused 1x1-conv heads == one (20,Cin)x(Cin,TILE) MXU matmul ----------
    heads = jnp.dot(w_ref[...], x, preferred_element_type=jnp.float32) + b_ref[...]
    ver = heads[0:VER_DIM, :]                            # (18, TILE), sublane-0 aligned
    seg = heads[VER_DIM:HEAD_DIM, :]                     # (2,  TILE)
    ver_ref[0] = ver.astype(ver_ref.dtype)
    seg_ref[0] = seg.astype(seg_ref.dtype)

    mask_row = mask_ref[0].astype(jnp.int32)             # (1, TILE)
    vw = vw_ref[0]                                       # (1, TILE) f32
    vert = vert_ref[0].astype(jnp.float32)               # (18, TILE)

    seg0 = seg[0:1, :]
    seg1 = seg[1:2, :]

    # ---- loss_seg: 2-class cross entropy, lse = max + log(1 + exp(-|d|)) ------------
    m = jnp.maximum(seg0, seg1)
    lse = m + jnp.log(1.0 + jnp.exp(-jnp.abs(seg0 - seg1)))
    x_true = jnp.where(mask_row == 1, seg1, seg0)        # (1, TILE)
    ce = lse - x_true                                    # (1, TILE)

    # ---- loss_vertex: smooth_l1_loss(sigma=1, normalize=True, reduce=False) ---------
    diff = vw * (ver - vert)                             # (18, TILE)
    ad = jnp.abs(diff)
    in_loss = jnp.where(ad < 1.0, 0.5 * diff * diff, ad - 0.5)
    vsum = jnp.sum(in_loss, axis=0, keepdims=True)       # (1, TILE)

    # ---- precision / recall partials (foreground = class 1, 2-class argmax) ---------
    pos_pred = seg1 > seg0
    pos_gt = mask_row == 1
    tp = jnp.logical_and(pos_pred, pos_gt).astype(jnp.float32)
    fp = jnp.logical_and(pos_pred, jnp.logical_not(pos_gt)).astype(jnp.float32)
    fn = jnp.logical_and(jnp.logical_not(pos_pred), pos_gt).astype(jnp.float32)

    if needs_valid_mask:
        # padded pixels (mask/vw padded with 0) must not pollute CE or fp counts
        idx = jax.lax.broadcasted_iota(jnp.int32, (1, tile), 1) + t * tile
        valid = (idx < hw_true).astype(jnp.float32)
        ce = ce * valid
        tp = tp * valid
        fp = fp * valid
        fn = fn * valid

    zero = jnp.zeros((1, 128), jnp.float32)
    stats_ref[0, 0] = jnp.concatenate(
        [_fold_lanes_to_128(ce), _fold_lanes_to_128(vsum), _fold_lanes_to_128(vw),
         _fold_lanes_to_128(tp), _fold_lanes_to_128(fp), _fold_lanes_to_128(fn),
         zero, zero], axis=0)                            # (8, 128)


def _choose_tiling(hw, max_tile):
    """Pick a lane tile (multiple of 128) and the padded H*W extent."""
    max_tile = max(128, (max_tile // 128) * 128)
    hw128 = ((hw + 127) // 128) * 128
    if hw128 <= max_tile:
        return hw128, hw128                  # single large tile, no padding waste
    # prefer a large exact divisor of the 128-rounded extent: no padding at all
    for cand in range(max_tile, max_tile // 2 - 1, -128):
        if hw128 % cand == 0:
            return cand, hw128
    # otherwise pad up to a multiple of max_tile and mask the tail in-kernel
    nt = -(-hw128 // max_tile)
    return max_tile, nt * max_tile


def _pad_hw(a, hw_pad):
    pad = hw_pad - a.shape[-1]
    if pad == 0:
        return a
    return jnp.pad(a, ((0, 0), (0, 0), (0, pad)))


def net_wrapper_forward(image, mask, vertex, vertex_weights, params, *,
                        max_tile=16384, out_dtype=jnp.bfloat16):
    """image (N,Cin,H,W) f32, mask (N,H,W) int, vertex (N,VER_DIM,H,W) f32,
    vertex_weights (N,1,H,W) f32.  Returns the 6-tuple of NetWrapper.forward."""
    n, cin, h, w = image.shape
    hw = h * w
    tile, hw_pad = _choose_tiling(hw, max_tile)
    nt = hw_pad // tile
    needs_valid_mask = hw_pad != hw

    # channels-first + flattened spatial: pure reshapes, no transposes.
    x = _pad_hw(image.reshape(n, cin, hw).astype(jnp.float32), hw_pad)
    vert = _pad_hw(vertex.reshape(n, VER_DIM, hw).astype(jnp.bfloat16), hw_pad)
    vw = _pad_hw(vertex_weights.reshape(n, 1, hw).astype(jnp.float32), hw_pad)
    mask2 = _pad_hw(mask.reshape(n, 1, hw).astype(jnp.int8), hw_pad)

    # fuse the two 1x1-conv heads into one resident weight/bias (vertex rows first so
    # the large in-kernel slice starts at sublane 0).
    w_seg, b_seg, w_ver, b_ver = params   # (2,Cin), (2,1), (18,Cin), (18,1)
    w_all = jnp.concatenate([w_ver, w_seg], axis=0).astype(jnp.float32)   # (20, Cin)
    b_all = jnp.concatenate([b_ver, b_seg], axis=0).astype(jnp.float32)   # (20, 1)

    kernel = functools.partial(netwrapper_kernel, hw_true=hw,
                               needs_valid_mask=needs_valid_mask)

    out_shapes = (
        jax.ShapeDtypeStruct((n, SEG_DIM, hw_pad), out_dtype),            # seg logits
        jax.ShapeDtypeStruct((n, VER_DIM, hw_pad), out_dtype),            # vertex pred
        jax.ShapeDtypeStruct((n, nt, _STATS_ROWS, 128), jnp.float32),     # per-tile stats
    )
    in_specs = [
        pl.BlockSpec((1, cin, tile), lambda b, t: (b, 0, t)),             # x
        pl.BlockSpec((HEAD_DIM, cin), lambda b, t: (0, 0)),               # fused weight
        pl.BlockSpec((HEAD_DIM, 1), lambda b, t: (0, 0)),                 # fused bias
        pl.BlockSpec((1, 1, tile), lambda b, t: (b, 0, t)),               # mask (int8)
        pl.BlockSpec((1, VER_DIM, tile), lambda b, t: (b, 0, t)),         # vertex tgt (bf16)
        pl.BlockSpec((1, 1, tile), lambda b, t: (b, 0, t)),               # vertex weights
    ]
    out_specs = (
        pl.BlockSpec((1, SEG_DIM, tile), lambda b, t: (b, 0, t)),
        pl.BlockSpec((1, VER_DIM, tile), lambda b, t: (b, 0, t)),
        pl.BlockSpec((1, 1, _STATS_ROWS, 128), lambda b, t: (b, t, 0, 0)),
    )

    seg, ver, stats = pl.pallas_call(
        kernel,
        out_shape=out_shapes,
        grid=(n, nt),
        in_specs=in_specs,
        out_specs=out_specs,
        compiler_params=pltpu.CompilerParams(
            dimension_semantics=("parallel", "parallel"),
            vmem_limit_bytes=32 * 1024 * 1024),
    )(x, w_all, b_all, mask2, vert, vw)

    if needs_valid_mask:
        seg = seg[:, :, :hw]
        ver = ver[:, :, :hw]
    seg_pred = seg.reshape(n, SEG_DIM, h, w)
    vertex_pred = ver.reshape(n, VER_DIM, h, w)

    # finish the (tiny) reductions of the lane-folded per-tile partials in XLA.
    loss_seg = jnp.sum(stats[:, :, _ROW_CE, :], axis=(1, 2)) / float(hw)          # (N,)
    wsum = jnp.sum(stats[:, :, _ROW_WSUM, :], axis=(1, 2))                         # (N,)
    loss_vertex = jnp.sum(stats[:, :, _ROW_VLOSS, :], axis=(1, 2)) / (
        float(VER_DIM) * wsum + 1e-3)                                              # (N,)
    tp = jnp.sum(stats[:, :, _ROW_TP, :])
    fp = jnp.sum(stats[:, :, _ROW_FP, :])
    fn = jnp.sum(stats[:, :, _ROW_FN, :])
    precision = tp / (tp + fp + 1e-5)
    recall = tp / (tp + fn + 1e-5)
    return seg_pred, vertex_pred, loss_seg, loss_vertex, precision, recall


if __name__ == "__main__":
    key = jax.random.PRNGKey(0)
    N, Cin, H, W = 2, 4, 16, 16
    k1, k2, k3, k4, k5 = jax.random.split(key, 5)

    image = jax.random.normal(k1, (N, Cin, H, W), jnp.float32)
    mask = jax.random.randint(k2, (N, H, W), 0, SEG_DIM).astype(jnp.int32)
    vertex = jax.random.normal(k3, (N, VER_DIM, H, W), jnp.float32)
    # PVNet uses the foreground mask as vertex weights, shape (N,1,H,W)
    vertex_weights = mask.astype(jnp.float32)[:, None, :, :]

    # deterministic synthetic 1x1-conv head parameters (channels-first: (Cout, Cin))
    w_seg = 0.1 * jax.random.normal(k4, (SEG_DIM, Cin), jnp.float32)
    b_seg = jnp.zeros((SEG_DIM, 1), jnp.float32)
    w_ver = 0.1 * jax.random.normal(k5, (VER_DIM, Cin), jnp.float32)
    b_ver = jnp.zeros((VER_DIM, 1), jnp.float32)

    fwd = jax.jit(functools.partial(net_wrapper_forward,
                                    max_tile=16384, out_dtype=jnp.bfloat16))
    outs = fwd(image, mask, vertex, vertex_weights, (w_seg, b_seg, w_ver, b_ver))
    jax.block_until_ready(outs)
    print("KERNEL_OK")
</pallas_src>

<mosaic_0001>
module attributes {stable_mosaic.version = 11 : i64} {
  func.func @netwrapper_kernel(%arg0: i32, %arg1: i32, %arg2: memref<1x4x256xf32, #tpu.memory_space<vmem>>, %arg3: memref<20x4xf32, #tpu.memory_space<vmem>>, %arg4: memref<20x1xf32, #tpu.memory_space<vmem>>, %arg5: memref<1x1x256xi8, #tpu.memory_space<vmem>>, %arg6: memref<1x18x256xbf16, #tpu.memory_space<vmem>>, %arg7: memref<1x1x256xf32, #tpu.memory_space<vmem>>, %arg8: memref<1x2x256xbf16, #tpu.memory_space<vmem>>, %arg9: memref<1x18x256xbf16, #tpu.memory_space<vmem>>, %arg10: memref<1x1x8x128xf32, #tpu.memory_space<vmem>>) attributes {dimension_semantics = [#tpu.dimension_semantics<parallel>, #tpu.dimension_semantics<parallel>], iteration_bounds = array<i64: 2, 1>, scalar_prefetch = 0 : i64, scratch_operands = 0 : i64, tpu.core_type = #tpu.core_type<tc>, window_params = [{transform_indices = @transform_0, window_bounds = array<i64: 1, 4, 256>}, {pipeline_mode = #tpu.pipeline_mode<synchronous>, transform_indices = @transform_1, window_bounds = array<i64: 20, 4>}, {pipeline_mode = #tpu.pipeline_mode<synchronous>, transform_indices = @transform_2, window_bounds = array<i64: 20, 1>}, {transform_indices = @transform_3, window_bounds = array<i64: 1, 1, 256>}, {transform_indices = @transform_4, window_bounds = array<i64: 1, 18, 256>}, {transform_indices = @transform_5, window_bounds = array<i64: 1, 1, 256>}, {transform_indices = @transform_6, window_bounds = array<i64: 1, 2, 256>}, {transform_indices = @transform_7, window_bounds = array<i64: 1, 18, 256>}, {transform_indices = @transform_8, window_bounds = array<i64: 1, 1, 8, 128>}]} {
    %c0 = arith.constant 0 : index
    %c0_0 = arith.constant 0 : index
    %c0_1 = arith.constant 0 : index
    %0 = vector.load %arg2[%c0, %c0_0, %c0_1] : memref<1x4x256xf32, #tpu.memory_space<vmem>>, vector<1x4x256xf32>
    %1 = vector.shape_cast %0 : vector<1x4x256xf32> to vector<4x256xf32>
    %c0_2 = arith.constant 0 : index
    %c0_3 = arith.constant 0 : index
    %2 = vector.load %arg3[%c0_2, %c0_3] : memref<20x4xf32, #tpu.memory_space<vmem>>, vector<20x4xf32>
    %cst = arith.constant dense<0.000000e+00> : vector<20x256xf32>
    %3 = tpu.matmul %2, %1, %cst {dimension_numbers = #tpu.dot_dimension_numbers<[1], [0], [0], [1], [0, 0, 1, 1], [], []>} : vector<20x4xf32>, vector<4x256xf32>, vector<20x256xf32> -> vector<20x256xf32>
    %c0_4 = arith.constant 0 : index
    %c0_5 = arith.constant 0 : index
    %4 = vector.load %arg4[%c0_4, %c0_5] : memref<20x1xf32, #tpu.memory_space<vmem>>, vector<20x1xf32>
    %5 = vector.broadcast %4 : vector<20x1xf32> to vector<20x256xf32>
    %6 = arith.addf %3, %5 : vector<20x256xf32>
    %7 = vector.extract_strided_slice %6 {offsets = [0, 0], sizes = [18, 256], strides = [1, 1]} : vector<20x256xf32> to vector<18x256xf32>
    %8 = vector.extract_strided_slice %6 {offsets = [18, 0], sizes = [2, 256], strides = [1, 1]} : vector<20x256xf32> to vector<2x256xf32>
    %9 = arith.truncf %7 : vector<18x256xf32> to vector<18x256xbf16>
    %c0_6 = arith.constant 0 : index
    %c0_7 = arith.constant 0 : index
    %c0_8 = arith.constant 0 : index
    %10 = vector.load %arg9[%c0_6, %c0_7, %c0_8] : memref<1x18x256xbf16, #tpu.memory_space<vmem>>, vector<1x18x256xbf16>
    %11 = vector.shape_cast %10 : vector<1x18x256xbf16> to vector<18x256xbf16>
    %12 = vector.shape_cast %9 : vector<18x256xbf16> to vector<1x18x256xbf16>
    tpu.vector_store %arg9[%c0_6, %c0_7, %c0_8], %12 {strides = array<i32>} : memref<1x18x256xbf16, #tpu.memory_space<vmem>>, vector<1x18x256xbf16>,
    %13 = arith.truncf %8 : vector<2x256xf32> to vector<2x256xbf16>
    %c0_9 = arith.constant 0 : index
    %c0_10 = arith.constant 0 : index
    %c0_11 = arith.constant 0 : index
    %14 = vector.load %arg8[%c0_9, %c0_10, %c0_11] : memref<1x2x256xbf16, #tpu.memory_space<vmem>>, vector<1x2x256xbf16>
    %15 = vector.shape_cast %14 : vector<1x2x256xbf16> to vector<2x256xbf16>
    %16 = vector.shape_cast %13 : vector<2x256xbf16> to vector<1x2x256xbf16>
    tpu.vector_store %arg8[%c0_9, %c0_10, %c0_11], %16 {strides = array<i32>} : memref<1x2x256xbf16, #tpu.memory_space<vmem>>, vector<1x2x256xbf16>,
    %c0_12 = arith.constant 0 : index
    %c0_13 = arith.constant 0 : index
    %c0_14 = arith.constant 0 : index
    %17 = vector.load %arg5[%c0_12, %c0_13, %c0_14] : memref<1x1x256xi8, #tpu.memory_space<vmem>>, vector<1x1x256xi8>
    %18 = vector.shape_cast %17 : vector<1x1x256xi8> to vector<1x256xi8>
    %19 = arith.extsi %18 : vector<1x256xi8> to vector<1x256xi32>
    %c0_15 = arith.constant 0 : index
    %c0_16 = arith.constant 0 : index
    %c0_17 = arith.constant 0 : index
    %20 = vector.load %arg7[%c0_15, %c0_16, %c0_17] : memref<1x1x256xf32, #tpu.memory_space<vmem>>, vector<1x1x256xf32>
    %21 = vector.shape_cast %20 : vector<1x1x256xf32> to vector<1x256xf32>
    %c0_18 = arith.constant 0 : index
    %c0_19 = arith.constant 0 : index
    %c0_20 = arith.constant 0 : index
    %22 = vector.load %arg6[%c0_18, %c0_19, %c0_20] : memref<1x18x256xbf16, #tpu.memory_space<vmem>>, vector<1x18x256xbf16>
    %23 = vector.shape_cast %22 : vector<1x18x256xbf16> to vector<18x256xbf16>
    %24 = arith.extf %23 : vector<18x256xbf16> to vector<18x256xf32>
    %25 = vector.extract_strided_slice %8 {offsets = [0, 0], sizes = [1, 256], strides = [1, 1]} : vector<2x256xf32> to vector<1x256xf32>
    %26 = vector.extract_strided_slice %8 {offsets = [1, 0], sizes = [1, 256], strides = [1, 1]} : vector<2x256xf32> to vector<1x256xf32>
    %27 = arith.maximumf %25, %26 : vector<1x256xf32>
    %28 = arith.subf %25, %26 : vector<1x256xf32>
    %29 = math.absf %28 : vector<1x256xf32>
    %cst_21 = arith.constant 0.000000e+00 : f32
    %30 = vector.broadcast %cst_21 : f32 to vector<1x256xf32>
    %31 = arith.subf %30, %29 : vector<1x256xf32>
    %32 = math.exp %31 : vector<1x256xf32>
    %cst_22 = arith.constant 1.000000e+00 : f32
    %33 = vector.broadcast %cst_22 : f32 to vector<1x256xf32>
    %34 = arith.addf %33, %32 : vector<1x256xf32>
    %35 = math.log %34 : vector<1x256xf32>
    %36 = arith.addf %27, %35 : vector<1x256xf32>
    %c1_i32 = arith.constant 1 : i32
    %37 = vector.broadcast %c1_i32 : i32 to vector<1x256xi32>
    %38 = arith.cmpi eq, %19, %37 : vector<1x256xi32>
    %39 = arith.select %38, %26, %25 : vector<1x256xi1>, vector<1x256xf32>
    %40 = arith.subf %36, %39 : vector<1x256xf32>
    %41 = arith.subf %7, %24 : vector<18x256xf32>
    %42 = vector.broadcast %21 : vector<1x256xf32> to vector<18x256xf32>
    %43 = arith.mulf %42, %41 : vector<18x256xf32>
    %44 = math.absf %43 : vector<18x256xf32>
    %cst_23 = arith.constant 1.000000e+00 : f32
    %45 = vector.broadcast %cst_23 : f32 to vector<18x256xf32>
    %46 = arith.cmpf olt, %44, %45 : vector<18x256xf32>
    %cst_24 = arith.constant 5.000000e-01 : f32
    %47 = vector.broadcast %cst_24 : f32 to vector<18x256xf32>
    %48 = arith.mulf %47, %43 : vector<18x256xf32>
    %49 = arith.mulf %48, %43 : vector<18x256xf32>
    %cst_25 = arith.constant 5.000000e-01 : f32
    %50 = vector.broadcast %cst_25 : f32 to vector<18x256xf32>
    %51 = arith.subf %44, %50 : vector<18x256xf32>
    %52 = arith.select %46, %49, %51 : vector<18x256xi1>, vector<18x256xf32>
    %cst_26 = arith.constant dense<0.000000e+00> : vector<256xf32>
    %53 = vector.multi_reduction <add>, %52, %cst_26 [0] : vector<18x256xf32> to vector<256xf32>
    %54 = vector.shape_cast %53 : vector<256xf32> to vector<1x256xf32>
    %55 = arith.cmpf ogt, %26, %25 : vector<1x256xf32>
    %c1_i32_27 = arith.constant 1 : i32
    %56 = vector.broadcast %c1_i32_27 : i32 to vector<1x256xi32>
    %57 = arith.cmpi eq, %19, %56 : vector<1x256xi32>
    %58 = arith.andi %55, %57 : vector<1x256xi1>
    %59 = arith.extui %58 : vector<1x256xi1> to vector<1x256xi32>
    %60 = arith.sitofp %59 : vector<1x256xi32> to vector<1x256xf32>
    %cst_28 = arith.constant dense<true> : vector<1x256xi1>
    %61 = arith.xori %57, %cst_28 : vector<1x256xi1>
    %62 = arith.andi %55, %61 : vector<1x256xi1>
    %63 = arith.extui %62 : vector<1x256xi1> to vector<1x256xi32>
    %64 = arith.sitofp %63 : vector<1x256xi32> to vector<1x256xf32>
    %cst_29 = arith.constant dense<true> : vector<1x256xi1>
    %65 = arith.xori %55, %cst_29 : vector<1x256xi1>
    %66 = arith.andi %65, %57 : vector<1x256xi1>
    %67 = arith.extui %66 : vector<1x256xi1> to vector<1x256xi32>
    %68 = arith.sitofp %67 : vector<1x256xi32> to vector<1x256xf32>
    %cst_30 = arith.constant 0.000000e+00 : f32
    %69 = vector.broadcast %cst_30 : f32 to vector<1x128xf32>
    %70 = vector.extract_strided_slice %40 {offsets = [0, 0], sizes = [1, 128], strides = [1, 1]} : vector<1x256xf32> to vector<1x128xf32>
    %71 = vector.extract_strided_slice %40 {offsets = [0, 128], sizes = [1, 128], strides = [1, 1]} : vector<1x256xf32> to vector<1x128xf32>
    %72 = arith.addf %70, %71 : vector<1x128xf32>
    %73 = vector.extract_strided_slice %54 {offsets = [0, 0], sizes = [1, 128], strides = [1, 1]} : vector<1x256xf32> to vector<1x128xf32>
    %74 = vector.extract_strided_slice %54 {offsets = [0, 128], sizes = [1, 128], strides = [1, 1]} : vector<1x256xf32> to vector<1x128xf32>
    %75 = arith.addf %73, %74 : vector<1x128xf32>
    %76 = vector.extract_strided_slice %21 {offsets = [0, 0], sizes = [1, 128], strides = [1, 1]} : vector<1x256xf32> to vector<1x128xf32>
    %77 = vector.extract_strided_slice %21 {offsets = [0, 128], sizes = [1, 128], strides = [1, 1]} : vector<1x256xf32> to vector<1x128xf32>
    %78 = arith.addf %76, %77 : vector<1x128xf32>
    %79 = vector.extract_strided_slice %60 {offsets = [0, 0], sizes = [1, 128], strides = [1, 1]} : vector<1x256xf32> to vector<1x128xf32>
    %80 = vector.extract_strided_slice %60 {offsets = [0, 128], sizes = [1, 128], strides = [1, 1]} : vector<1x256xf32> to vector<1x128xf32>
    %81 = arith.addf %79, %80 : vector<1x128xf32>
    %82 = vector.extract_strided_slice %64 {offsets = [0, 0], sizes = [1, 128], strides = [1, 1]} : vector<1x256xf32> to vector<1x128xf32>
    %83 = vector.extract_strided_slice %64 {offsets = [0, 128], sizes = [1, 128], strides = [1, 1]} : vector<1x256xf32> to vector<1x128xf32>
    %84 = arith.addf %82, %83 : vector<1x128xf32>
    %85 = vector.extract_strided_slice %68 {offsets = [0, 0], sizes = [1, 128], strides = [1, 1]} : vector<1x256xf32> to vector<1x128xf32>
    %86 = vector.extract_strided_slice %68 {offsets = [0, 128], sizes = [1, 128], strides = [1, 1]} : vector<1x256xf32> to vector<1x128xf32>
    %87 = arith.addf %85, %86 : vector<1x128xf32>
    %88 = tpu.concatenate %72, %75, %78, %81, %84, %87, %69, %69 in 0 : vector<1x128xf32>, vector<1x128xf32>, vector<1x128xf32>, vector<1x128xf32>, vector<1x128xf32>, vector<1x128xf32>, vector<1x128xf32>, vector<1x128xf32> -> vector<8x128xf32>
    %c0_31 = arith.constant 0 : index
    %c0_32 = arith.constant 0 : index
    %c0_33 = arith.constant 0 : index
    %c0_34 = arith.constant 0 : index
    %89 = vector.load %arg10[%c0_31, %c0_32, %c0_33, %c0_34] : memref<1x1x8x128xf32, #tpu.memory_space<vmem>>, vector<1x1x8x128xf32>
    %90 = vector.shape_cast %89 : vector<1x1x8x128xf32> to vector<8x128xf32>
    %91 = vector.shape_cast %88 : vector<8x128xf32> to vector<1x1x8x128xf32>
    tpu.vector_store %arg10[%c0_31, %c0_32, %c0_33, %c0_34], %91 {strides = array<i32>} : memref<1x1x8x128xf32, #tpu.memory_space<vmem>>, vector<1x1x8x128xf32>,
    return
  }
  func.func @transform_0(%arg0: i32, %arg1: i32) -> (i32, i32, i32) {
    %c0_i32 = arith.constant 0 : i32
    %c0_i32_0 = arith.constant 0 : i32
    return %arg0, %c0_i32, %arg1 : i32, i32, i32
  }
  func.func @transform_1(%arg0: i32, %arg1: i32) -> (i32, i32) {
    %c0_i32 = arith.constant 0 : i32
    %c0_i32_0 = arith.constant 0 : i32
    %c0_i32_1 = arith.constant 0 : i32
    return %c0_i32, %c0_i32_0 : i32, i32
  }
  func.func @transform_2(%arg0: i32, %arg1: i32) -> (i32, i32) {
    %c0_i32 = arith.constant 0 : i32
    %c0_i32_0 = arith.constant 0 : i32
    %c0_i32_1 = arith.constant 0 : i32
    return %c0_i32, %c0_i32_0 : i32, i32
  }
  func.func @transform_3(%arg0: i32, %arg1: i32) -> (i32, i32, i32) {
    %c0_i32 = arith.constant 0 : i32
    %c0_i32_0 = arith.constant 0 : i32
    return %arg0, %c0_i32, %arg1 : i32, i32, i32
  }
  func.func @transform_4(%arg0: i32, %arg1: i32) -> (i32, i32, i32) {
    %c0_i32 = arith.constant 0 : i32
    %c0_i32_0 = arith.constant 0 : i32
    return %arg0, %c0_i32, %arg1 : i32, i32, i32
  }
  func.func @transform_5(%arg0: i32, %arg1: i32) -> (i32, i32, i32) {
    %c0_i32 = arith.constant 0 : i32
    %c0_i32_0 = arith.constant 0 : i32
    return %arg0, %c0_i32, %arg1 : i32, i32, i32
  }
  func.func @transform_6(%arg0: i32, %arg1: i32) -> (i32, i32, i32) {
    %c0_i32 = arith.constant 0 : i32
    %c0_i32_0 = arith.constant 0 : i32
    return %arg0, %c0_i32, %arg1 : i32, i32, i32
  }
  func.func @transform_7(%arg0: i32, %arg1: i32) -> (i32, i32, i32) {
    %c0_i32 = arith.constant 0 : i32
    %c0_i32_0 = arith.constant 0 : i32
    return %arg0, %c0_i32, %arg1 : i32, i32, i32
  }
  func.func @transform_8(%arg0: i32, %arg1: i32) -> (i32, i32, i32, i32) {
    %c0_i32 = arith.constant 0 : i32
    %c0_i32_0 = arith.constant 0 : i32
    %c0_i32_1 = arith.constant 0 : i32
    return %arg0, %arg1, %c0_i32, %c0_i32_0 : i32, i32, i32, i32
  }
}

</mosaic_0001>

<bundles_post_ra>
// kernel: net_wrapper_forward.1
= control target key start
LH: loop header
LB: loop body
LE: loop exit
PB: predicated region body
PF: predicated region fallthrough
CT: control target
= control target key end

     0   :  { %s1251_s27 = smov 0   ;;  %s1253_s28 = smov 0   ;;  %s1507_s0 = inlined_call_operand.vmem [shape: f32[2,4,256], index: 0, kind: input, shape index: {}]   ;;  %s1508_s1 = inlined_call_operand.vmem [shape: f32[20,4], index: 1, kind: input, shape index: {}]   ;;  %s1509_s2 = inlined_call_operand.vmem [shape: f32[20,1], index: 2, kind: input, shape index: {}]   ;;  %s1510_s3 = inlined_call_operand.vmem [shape: s8[2,1,256], index: 3, kind: input, shape index: {}]   ;;  %s1511_s4 = inlined_call_operand.vmem [shape: bf16[2,18,256], index: 4, kind: input, shape index: {}]   ;;  %s1512_s5 = inlined_call_operand.vmem [shape: f32[2,1,256], index: 5, kind: input, shape index: {}]   ;;  %s1513_s6 = inlined_call_operand.vmem [shape: bf16[2,2,256], index: 6, kind: output, shape index: {0}]   ;;  %s1514_s7 = inlined_call_operand.vmem [shape: bf16[2,18,256], index: 7, kind: output, shape index: {1}]   ;;  %s1515_s8 = inlined_call_operand.vmem [shape: f32[2,1,8,128], index: 8, kind: output, shape index: {2}]  }
   0x1   :  { %s1255_s29 = smov 0  }
   0x2 LB: > { %s31_s30 = sadd.s32 1, %s1196_s28  ;;  %p1097_p0 = scmp.ge.s32.totalorder %s1200_s29, 1  ;;  %s1200_s29 = sphi %s1255_s29, %s19_s29   ;;  %s1196_s28 = sphi %s1253_s28, %s1541_s28   ;;  %s1192_s27 = sphi %s1251_s27, %s1540_s27  }
   0x3   : > { %p33_p1 = scmp.ge.s32.totalorder %s31_s30, 2  ;;  %p341_p2 = scmp.lt.s32.totalorder %s1200_s29, 3 }
   0x5   : > { %s1543_s30 = smov (%p33_p1, %s31_s30), 0  ;;  %p342_p3 = pnand %p1097_p0, %p341_p2 }
   0x6   : > { %p424_p4 = scmp.lt.s32.totalorder (!%p342_p3), %s1192_s27, 1 }
   0x7   : > { %345 = sbr.rel (%p342_p3) target bundleno = 280 (0x118), region = 44 }
   0xc   : > { %v1202_v0 = vmov 0.0   ;;  %s1545_s27 = smov (!%p424_p4, %s1192_s27), 1  ;;  %v1203_v1 = vmov 0   ;;  %v493_v2 = vld [vmem:[%s1509_s2 + $0x10] sm:$0xf]  ;;  %v492_v3 = vld [vmem:[%s1509_s2 + $0x8] sm:$0xff]  ;;  %v636_v20 = vlaneseq }
   0xd   : > { %590 = vmatprep.mubr.f32.mxu0 %v1202_v0  ;;  %596 = vmatprep.mubr.f32.mxu1 %v1202_v0  ;;  %s1132_s13 = sshll.u32 %s1545_s27, 3  ;;  %s1281_s14 = sshll.u32 %s1545_s27, 1  ;;  %v491_v4 = vld [vmem:[%s1509_s2] sm:$0xff]  ;;  %vm521_vm0 = vcmask 1043456   ;;  %vm511_vm1 = vcmask 31744   ;;  %v489_v9 = vld [vmem:[%s1508_s1 + $0x8] sm:$0xff] }
   0xe   : > { %1167 = vset.pattern.permute.xlu0 %v1203_v1  ;;  %1168 = vset.pattern.permute.xlu1 %v1203_v1  ;;  %s431_s19 = scalar_lea.vmem %s1507_s0, %s1132_s13  ;;  %s440_s22 = scalar_lea.vmem %s1510_s3, %s1281_s14  ;;  %v488_v8 = vld [vmem:[%s1508_s1] sm:$0xff]  ;;  %vm1204_vm3 = vmmov 1   ;;  %v490_v13 = vld [vmem:[%s1508_s1 + $0x10] sm:$0xf]  ;;  %v1205_v29 = vmov 1966171168  }
   0xf   : > { %506 = vperm.xlu0 %1167, %v493_v2   ;;  %501 = vperm.xlu1 %1168, %v492_v3   ;;  %v487_v5 = vld [vmem:[%s431_s19] sm:$0xff]  ;;  %s1138_s11 = smul.u32 24, %s1545_s27  ;;  %v634_v30 = vunpack.c.l.s4 %v1205_v29  ;;  %v1334_v31 = vshrl.u32 %v636_v20, 7  ;;  %s468_s25 = scalar_lea.vmem %s1513_s6, %s1281_s14  ;;  %vm770_vm11 = vcmask 1041408  }
  0x10   : > { %v510_v6 = vcombine.high %v487_v5, %v487_v5  ;;  %v650_v7 = vld [vmem:[%s440_s22] sm:$0x3]  ;;  %s459_s22 = scalar_lea.vmem %s1512_s5, %s1281_s14  ;;  %s486_s9 = scalar_lea.vmem %s1515_s8, %s1132_s13 }
  0x11   : > { %v651_v10 = vunpack.c.0.s8 %v650_v7  ;;  %s450_s16 = scalar_lea.vmem %s1511_s4, %s1138_s11  ;;  %s1332_s19 = scalar_lea.vmem %s1514_s7, %s1138_s11  ;;  %v635_v36 = vunpack.c.0.s8 %v634_v30  ;;  %v1345_v37 = vsub.s32 0, %v1334_v31  ;;  %v1348_v41 = vld [vmem:[%s459_s22] sm:$0x3]  ;;  %v723_v43 = vsub.s32 1, %v1334_v31 }
  0x12   : > { %1106 = vmatprep.subr.msk.mxu0 %vm521_vm0, %v510_v6  ;;  %1136 = vmatprep.subr.msk.mxu1 %vm521_vm0, %v510_v6  ;;  %v653_v34 = vld [vmem:[%s450_s16] sm:$0xff]  ;;  %v654_v35 = vld [vmem:[%s450_s16 + $0x8] sm:$0xff]  ;;  %v655_v38 = vld [vmem:[%s450_s16 + $0x10] sm:$0x11] }
  0x13   : > { %496 = vperm.xlu0 %1167, %v491_v4   ;;  %1107 = vmatpush1.msk.msra.mxu0 %vm521_vm0, %v487_v5  ;;  %vm1305_vm2 = vcmp.eq.s32.totalorder %v651_v10, 1  ;;  %v656_v39 = vunpack.c.l.bf16 %v653_v34  ;;  %v657_v42 = vunpack.c.h.bf16 %v653_v34  ;;  %v659_v44 = vunpack.c.h.bf16 %v654_v35 }
  0x14   : > { %1137 = vmatpush1.msk.msra.mxu1 %vm521_vm0, %v487_v5  ;;  %1108 = vmatmul.mubr.msk.f32.vlgmr.msra.gmra.mxu0 %vm511_vm1, %v488_v8  ;;  %v1313_v12 = vsel %vm1305_vm2, 1, %v1203_v1  ;;  %vm811_vm4 = vmxor %vm1305_vm2, %vm1204_vm3  ;;  %v658_v45 = vunpack.c.l.bf16 %v654_v35  ;;  %v660_v47 = vunpack.c.l.bf16 %v655_v38  ;;  %v638_v48 = vsub.s32 %v635_v36, %v1334_v31 }
  0x15   : > { %1109 = vmatmul.mubr.msk.f32.vlgmr.msra.gmra.mxu1 %vm511_vm1, %v489_v9  ;;  %v1322_v14 = vsel %vm811_vm4, 1, %v1203_v1  ;;  %v720_v50 = vrot.slane %v1348_v41, %v1345_v37  ;;  %v724_v53 = vrot.slane %v1348_v41, %v723_v43  ;;  %v661_v61 = vunpack.c.h.bf16 %v655_v38 }
  0x16   : > { %602 = vmatprep.mubr.f32.mxu1 %v1202_v0 }
  0x19   : > { %1110 = vmatmul.mubr.msk.f32.gmra.mxu1 %vm511_vm1, %v490_v13 }
  0x8a   : > { %v507_v15 = vpop.permute.xlu0 %506  ;;  %v502_v19 = vpop.permute.xlu1 %501 }
  0x8e   : > { %v497_v16 = vpop.permute.xlu0 %496 }
  0xd4   : > { %v592_v17 = vpop.f32.mrf.mxu0 }
  0xd5   : > { %v598_v18 = vpop.f32.mrf.mxu1  ;;  %v593_v23 = vadd.f32 %v592_v17, %v497_v16 }
  0xd6   : > { %v594_v21 = vpop.f32.mrf.mxu0  ;;  %v599_v26 = vadd.f32 %v598_v18, %v502_v19 }
  0xd7   : > { %v600_v22 = vpop.f32.mrf.mxu1  ;;  %v595_v24 = vadd.f32 %v594_v21, %v497_v16  ;;  %v710_v49 = vsub.f32 %v593_v23, %v656_v39 }
  0xd8   : > { %v601_v25 = vadd.f32 %v600_v22, %v502_v19  ;;  %v712_v56 = vsub.f32 %v599_v26, %v658_v45 }
  0xd9   : > { %v604_v27 = vpop.f32.mrf.mxu1  ;;  %v1133_v28 = vpack.c.bf16 %v595_v24, %v593_v23  ;;  %v711_v52 = vsub.f32 %v595_v24, %v657_v42  ;;  %v727_v62 = vmul.f32 %v720_v50, %v710_v49 }
  0xda   : > { %v1134_v32 = vpack.c.bf16 %v601_v25, %v599_v26  ;;  %v1336_v33 = vadd.f32 %v604_v27, %v507_v15  ;;  %v713_v54 = vsub.f32 %v601_v25, %v659_v44  ;;  %v729_v5 = vmul.f32 %v720_v50, %v712_v56 }
  0xdb   : > { %629 = vst [vmem:[%s1332_s19] sm:$0xff] %v1133_v28  ;;  %v606_v46 = vpop.f32.mrf.mxu1  ;;  %v728_v1 = vmul.f32 %v724_v53, %v711_v52  ;;  %v745_v10 = vmul.f32 0.5, %v727_v62  ;;  %v733_v19 = vand.u32 2147483647, %v727_v62 }
  0xdc   : > { %630 = vst [vmem:[%s1332_s19 + $0x8] sm:$0xff] %v1134_v32  ;;  %v664_v40 = vrot.slane %v1336_v33, 1  ;;  %v1358_v55 = vadd.f32 %v606_v46, %v507_v15  ;;  %v714_v58 = vsub.f32 %v1336_v33, %v660_v47  ;;  %v730_v2 = vmul.f32 %v724_v53, %v713_v54 }
  0xdd   : > { %v734_v15 = vand.u32 2147483647, %v728_v1  ;;  %v746_v16 = vmul.f32 0.5, %v728_v1  ;;  %v735_v20 = vand.u32 2147483647, %v729_v5  ;;  %v751_v26 = vmul.f32 %v745_v10, %v727_v62 }
  0xde   : > { %v670_v51 = vsub.f32 %v1336_v33, %v664_v40  ;;  %v1135_v59 = vpack.c.bf16 %v1358_v55, %v1336_v33  ;;  %v665_v60 = vrot.slane %v1358_v55, 1  ;;  %v731_v7 = vmul.f32 %v720_v50, %v714_v58 }
  0xdf   : > { %v715_v13 = vsub.f32 %v1358_v55, %v661_v61  ;;  %v748_v17 = vmul.f32 0.5, %v730_v2  ;;  %v736_v21 = vand.u32 2147483647, %v730_v2  ;;  %v747_v27 = vmul.f32 0.5, %v729_v5 }
  0xe0   : > { %v672_v57 = vand.u32 2147483647, %v670_v51  ;;  %631 = vst [vmem:[%s1332_s19 + $0x10] sm:$0x11] %v1135_v59  ;;  %v639_v3 = vrot.slane %v1135_v59, %v638_v48  ;;  %v671_v4 = vsub.f32 %v1358_v55, %v665_v60  ;;  %v737_v23 = vand.u32 2147483647, %v731_v7 }
  0xe1   : > { %v732_v22 = vmul.f32 %v724_v53, %v715_v13  ;;  %v749_v24 = vmul.f32 0.5, %v731_v7  ;;  %v752_v30 = vmul.f32 %v746_v16, %v728_v1  ;;  %v1119_v32 = vadd.f32 -0.5, %v734_v15 }
  0xe2   : > { %v674_v63 = vsub.f32 0.0, %v672_v57  ;;  %v640_v8 = vcombine.high %v639_v3, %v639_v3  ;;  %v673_v9 = vand.u32 2147483647, %v671_v4  ;;  %v754_v34 = vmul.f32 %v748_v17, %v730_v2 }
  0xe3   : > { %v738_v28 = vand.u32 2147483647, %v732_v22  ;;  %v750_v29 = vmul.f32 0.5, %v732_v22  ;;  %v1121_v35 = vadd.f32 -0.5, %v736_v21  ;;  %vm1377_vm6 = vcmp.lt.f32.partialorder %v734_v15, 1.0 }
  0xe4   : > { %v676_v6 = vmul.f32 1.442695, %v674_v63  ;;  %1115 = vst.sshfl [vmem:[%s468_s25] sm:$0x5 pattern:$0x73625140] %v640_v8  ;;  %v675_v18 = vsub.f32 0.0, %v673_v9  ;;  %v755_v44 = vmul.f32 %v749_v24, %v731_v7  ;;  %v753_v47 = vmul.f32 %v747_v27, %v729_v5 }
  0xe5   : > { %vm1373_vm5 = vcmp.lt.f32.partialorder %v738_v28, 1.0  ;;  %v756_v38 = vmul.f32 %v750_v29, %v732_v22  ;;  %v1123_v39 = vadd.f32 -0.5, %v738_v28  ;;  %vm1381_vm7 = vcmp.lt.f32.partialorder %v736_v21, 1.0 }
  0xe6   : > { %1170 = vpow2.f32 %v676_v6  ;;  %v678_v25 = vmul.f32 1.442695, %v675_v18  ;;  %v1122_v45 = vadd.f32 -0.5, %v737_v23  ;;  %v1118_v46 = vadd.f32 -0.5, %v733_v19 }
  0xe7   : > { %v1120_v48 = vadd.f32 -0.5, %v735_v20  ;;  %vm743_vm8 = vcmp.lt.f32.partialorder %v737_v23, 1.0  ;;  %vm739_vm9 = vcmp.lt.f32.partialorder %v733_v19, 1.0  ;;  %vm741_vm10 = vcmp.lt.f32.partialorder %v735_v20, 1.0 }
  0xe8   : > { %1172 = vpow2.f32 %v678_v25  ;;  %v768_v49 = vsel %vm1373_vm5, %v756_v38, %v1123_v39  ;;  %v764_v50 = vsel %vm1377_vm6, %v752_v30, %v1119_v32  ;;  %v766_v51 = vsel %vm1381_vm7, %v754_v34, %v1121_v35 }
  0xe9   : > { %v767_v52 = vsel %vm743_vm8, %v755_v44, %v1122_v45  ;;  %v763_v53 = vsel %vm739_vm9, %v751_v26, %v1118_v46  ;;  %v765_v54 = vsel %vm741_vm10, %v753_v47, %v1120_v48  ;;  %v780_v56 = vsel %vm770_vm11, %v768_v49, 0.0 }
  0xea   : > { %v779_v58 = vadd.f32 %v766_v51, %v764_v50  ;;  %v771_v61 = vsel %vm770_vm11, %v767_v52, 0.0  ;;  %v769_v62 = vadd.f32 %v765_v54, %v763_v53  ;;  %v704_v7 = vsub.s32 4, %v1334_v31 }
  0xeb   : > { %v816_v9 = vrot.slane %v1322_v14, %v1345_v37  ;;  %v788_v10 = vrot.slane %v1336_v33, 7  ;;  %v689_v13 = vcombine.low %v1336_v33, %v1358_v55  ;;  %v789_v16 = vrot.slane %v1358_v55, 7 }
  0xec   : > { %v781_v63 = vadd.f32 %v780_v56, %v779_v58  ;;  %v772_v1 = vadd.f32 %v771_v61, %v769_v62  ;;  %v798_v18 = vrot.slane %v1313_v12, %v1345_v37  ;;  %v802_v19 = vrot.slane %v1313_v12, %v704_v7 }
  0xed   : > { %v820_v31 = vrot.slane %v1322_v14, %v704_v7  ;;  %vm1404_vm12 = vcmp.ne.s32.totalorder %v816_v9, 0  ;;  %vm1409_vm13 = vcmp.gt.f32.partialorder %v1336_v33, %v788_v10  ;;  %v1116_v23 = vrot.slane %v689_v13, 11 }
  0xee   : > { %v782_v4 = vrot.slane %v781_v63, 4  ;;  %v773_v5 = vrot.slane %v772_v1, 4  ;;  %v1117_v24 = vrot.slane %v689_v13, 10  ;;  %vm1414_vm14 = vcmp.gt.f32.partialorder %v1358_v55, %v789_v16  ;;  %vm823_vm1 = vmand %vm1409_vm13, %vm1404_vm12 }
  0xef   : > { %v839_v12 = vrot.slane %v1348_v41, 1  ;;  %vm1419_vm15 = vcmp.ne.s32.totalorder %v820_v31, 0  ;;  %v668_v28 = vmax.f32 %v1336_v33, %v664_v40  ;;  %vm1430_vm4 = vcmp.ne.s32.totalorder %v798_v18, 0  ;;  %vm1443_vm6 = vmxor %vm1414_vm14, %vm1204_vm3 }
  0xf0   : > { %v783_v6 = vadd.f32 %v782_v4, %v781_v63  ;;  %v774_v8 = vadd.f32 %v773_v5, %v772_v1  ;;  %vm1434_vm5 = vcmp.ne.s32.totalorder %v802_v19, 0  ;;  %v696_v35 = vsel %vm1305_vm2, %v1116_v23, %v1117_v24  ;;  %vm1450_vm7 = vmxor %vm1409_vm13, %vm1204_vm3 }
  0xf1   : > { %v669_v11 = vmax.f32 %v1358_v55, %v665_v60  ;;  %v841_v42 = vadd.f32 %v839_v12, %v1348_v41  ;;  %vm824_vm2 = vmand %vm1414_vm14, %vm1419_vm15  ;;  %v701_v45 = vrot.slane %v696_v35, %v1345_v37  ;;  %v705_v46 = vrot.slane %v696_v35, %v704_v7 }
  0xf2   : > { %v784_v15 = vrot.slane %v783_v6, 2  ;;  %v775_v20 = vrot.slane %v774_v8, 2  ;;  %vm832_vm3 = vmand %vm1443_vm6, %vm1434_vm5  ;;  %v1127_v47 = vsel %vm824_vm2, 1.0, %v1202_v0  ;;  %v1126_v50 = vsel %vm823_vm1, 1.0, %v1202_v0 }
  0xf3   : > { %v1171_v57 = vpop.eup %1170  ;;  %vm831_vm8 = vmand %vm1450_vm7, %vm1430_vm4  ;;  %v1129_v48 = vsel %vm832_vm3, 1.0, %v1202_v0  ;;  %v852_v49 = vrot.slane %v841_v42, %v1345_v37  ;;  %v843_v56 = vadd.f32 %v1127_v47, %v1126_v50  ;;  %vm863_vm15 = vcmask 1042432  }
  0xf4   : > { %v680_v59 = vadd.f32 1.0, %v1171_v57  ;;  %v785_v26 = vadd.f32 %v784_v15, %v783_v6  ;;  %v776_v29 = vadd.f32 %v775_v20, %v774_v8  ;;  %vm806_vm9 = vmand %vm1414_vm14, %vm1434_vm5  ;;  %v1128_v53 = vsel %vm831_vm8, 1.0, %v1202_v0 }
  0xf5   : > { %v1173_v2 = vpop.eup %1172  ;;  %vm805_vm10 = vmand %vm1409_vm13, %vm1430_vm4  ;;  %v1125_v54 = vsel %vm806_vm9, 1.0, %v1202_v0  ;;  %vm860_vm14 = vcmask 1040384   ;;  %v844_v57 = vadd.f32 %v1129_v48, %v1128_v53  ;;  %v855_v63 = vrot.slane %v843_v56, 7 }
  0xf6   : > { %1174 = vlog2.f32 %v680_v59  ;;  %v681_v3 = vadd.f32 1.0, %v1173_v2  ;;  %v786_v39 = vrot.slane %v785_v26, 1  ;;  %v777_v43 = vrot.slane %v776_v29, 1 }
  0xf7   : > { %v1124_v59 = vsel %vm805_vm10, 1.0, %v1202_v0  ;;  %vm866_vm12 = vcmask 1044480   ;;  %v858_v2 = vrot.slane %v844_v57, 6  ;;  %vm868_vm13 = vcmask 1045504  }
  0xf8   : > { %1176 = vlog2.f32 %v681_v3  ;;  %v787_v60 = vadd.f32 %v786_v39, %v785_v26  ;;  %v778_v51 = vadd.f32 %v777_v43, %v776_v29  ;;  %v842_v61 = vadd.f32 %v1125_v54, %v1124_v59 }
  0xf9   : > { %vm870_vm1 = vcmask 1046528  }
  0xfa   : > { %v838_v37 = vadd.f32 %v787_v60, %v778_v51 }
 0x103   : > { %v1175_v17 = vpop.eup %1174 }
 0x104   : > { %v683_v25 = vmul.f32 0.6931472, %v1175_v17 }
 0x105   : > { %v1177_v30 = vpop.eup %1176 }
 0x106   : > { %v686_v40 = vadd.f32 %v683_v25, %v668_v28  ;;  %v685_v38 = vmul.f32 0.6931472, %v1177_v30 }
 0x108   : > { %v687_v44 = vadd.f32 %v685_v38, %v669_v11  ;;  %v708_v41 = vsub.f32 %v686_v40, %v701_v45 }
 0x10a   : > { %v709_v55 = vsub.f32 %v687_v44, %v705_v46 }
 0x10c   : > { %v837_v52 = vadd.f32 %v709_v55, %v708_v41 }
 0x10e   : > { %v846_v58 = vrot.slane %v837_v52, 2 }
 0x110   : > { %v861_v62 = vsel %vm860_vm14, %v846_v58, %v838_v37 }
 0x111   : > { %v862_v1 = vsel %vm770_vm11, %v861_v62, %v852_v49 }
 0x112   : > { %v864_v3 = vsel %vm863_vm15, %v862_v1, %v842_v61 }
 0x113   : > { %v865_v4 = vsel %vm521_vm0, %v864_v3, %v855_v63 }
 0x114   : > { %v867_v5 = vsel %vm866_vm12, %v865_v4, %v858_v2 }
 0x115   : > { %v869_v0 = vsel %vm868_vm13, %v867_v5, 0.0 }
 0x116   : > { %v871_v6 = vsel %vm870_vm1, %v869_v0, 0.0 }
 0x117   : > { %872 = vst [vmem:[%s486_s9] sm:$0xff] %v871_v6 }
 0x118 PF: > { %s19_s29 = sadd.s32 1, %s1200_s29   ;;  %s1540_s27 = smov %s1196_s28 }
 0x119   : > { %p16_p5 = scmp.ge.s32.totalorder %s19_s29, 4   ;;  %s1541_s28 = smov %s1543_s30 }
 0x11b   :  { %18 = sbr.rel (!%p16_p5) target bundleno = 2 (0x2), region = 107 }

</bundles_post_ra>
